<compile_context>
chip_gen: v7x
topology: tpu7x:2x2x1
jax: 0.10.0
libtpu: 0.0.40
codegen_flags: <defaults>
</compile_context>

<pallas_src>
import functools

import jax
import jax.numpy as jnp
from jax.experimental import pallas as pl
from jax.experimental.pallas import tpu as pltpu


# ---------------------------------------------------------------------------
# Pallas kernel: one bidirectional LSTM layer (grid axis 0 = direction)
# ---------------------------------------------------------------------------
def lstm_layer_kernel(xg_ref, whh_ref, out_ref):
    """Runs the full time recurrence for one direction of one layer.

    xg_ref  : (T, B, 4H)  precomputed x @ W_ih^T + b_ih + b_hh (f32)
    whh_ref : (H, 4H)     hidden->hidden weights, transposed, bf16
    out_ref : (T, B, H)   per-timestep hidden states (f32)

    Grid axis 0 (size 2, "parallel") selects the direction; the backward
    direction simply walks time in reverse via tt = T-1-t.
    """
    T, B, _ = xg_ref.shape
    H = whh_ref.shape[0]
    d = pl.program_id(0)                       # 0 = forward, 1 = backward

    whh = whh_ref[...]                         # hoisted: stays in vregs

    def step(t, carry):
        h, c = carry
        tt = jnp.where(d == 0, t, T - 1 - t)
        # Serial-path work: one (B,H)@(H,4H) MXU matmul + elementwise gates.
        gates = xg_ref[tt] + jnp.dot(
            h.astype(whh.dtype), whh, preferred_element_type=jnp.float32
        )                                      # (B, 4H) f32
        # NOTE: gate slabs are H=32 lanes inside one 128-lane vreg; at these
        # shapes the XLU extracts are negligible (padding 4H to 512 lanes
        # would quadruple the matmul).
        i_g = jax.nn.sigmoid(gates[:, 0 * H:1 * H])
        f_g = jax.nn.sigmoid(gates[:, 1 * H:2 * H])
        g_g = jnp.tanh(gates[:, 2 * H:3 * H])
        o_g = jax.nn.sigmoid(gates[:, 3 * H:4 * H])

        c_new = f_g * c + i_g * g_g            # f32 cell state
        h_new = o_g * jnp.tanh(c_new)
        out_ref[tt] = h_new
        return h_new, c_new

    h0 = jnp.zeros((B, H), jnp.float32)
    c0 = jnp.zeros((B, H), jnp.float32)
    jax.lax.fori_loop(0, T, step, (h0, c0), unroll=True)


def bilstm_layer(xg, whh_t_bf16):
    """xg: (2, T, B, 4H) f32; whh_t_bf16: (2, H, 4H) bf16 -> (2, T, B, H) f32."""
    _, T, Bp, G = xg.shape
    H = whh_t_bf16.shape[1]
    return pl.pallas_call(
        lstm_layer_kernel,
        out_shape=jax.ShapeDtypeStruct((2, T, Bp, H), jnp.float32),
        grid=(2,),
        in_specs=[
            pl.BlockSpec((None, T, Bp, G), lambda d: (d, 0, 0, 0)),  # gates
            pl.BlockSpec((None, H, G), lambda d: (d, 0, 0)),         # W_hh^T
        ],
        out_specs=pl.BlockSpec((None, T, Bp, H), lambda d: (d, 0, 0, 0)),
        compiler_params=pltpu.CompilerParams(
            dimension_semantics=("parallel",)   # directions are independent
        ),
    )(xg, whh_t_bf16)


# ---------------------------------------------------------------------------
# Model forward
# ---------------------------------------------------------------------------
def model_forward(tokens, params, num_layers):
    B, T = tokens.shape

    # Embedding gather kept in plain JAX glue.
    emb = jnp.take(params["embedding"], tokens, axis=0)        # (B, T, E)

    # Pad batch to a multiple of 8 sublanes for dense vector loads/stores.
    Bp = ((B + 7) // 8) * 8
    if Bp != B:
        emb = jnp.pad(emb, ((0, Bp - B), (0, 0), (0, 0)))
    x = jnp.transpose(emb, (1, 0, 2)).astype(jnp.float32)      # (T, Bp, E)

    prev = None                                                # (2, T, Bp, H)
    for l in range(num_layers):
        w_ih_f, w_hh_f, b_ih_f, b_hh_f = params[f"layer{l}_fwd"]
        w_ih_b, w_hh_b, b_ih_b, b_hh_b = params[f"layer{l}_bwd"]
        H = w_hh_f.shape[1]

        wih = jnp.stack([w_ih_f, w_ih_b])                      # (2, 4H, D_in)
        bias = jnp.stack([b_ih_f + b_hh_f, b_ih_b + b_hh_b])   # (2, 4H)
        whh_t = jnp.stack([w_hh_f.T, w_hh_b.T]).astype(jnp.bfloat16)  # (2,H,4H)

        # Input projection for ALL timesteps at once (hoisted out of the
        # recurrence). For layers >= 1 the fwd/bwd halves of W_ih consume the
        # stacked previous-layer output directly -> no concatenate needed.
        if l == 0:
            xg = jnp.einsum("tbe,zge->ztbg", x, wih)
        else:
            wih_r = wih.reshape(2, 4 * H, 2, H)
            xg = jnp.einsum("ptbh,zgph->ztbg", prev, wih_r)
        xg = (xg + bias[:, None, None, :]).astype(jnp.float32)  # (2,T,Bp,4H)

        prev = bilstm_layer(xg, whh_t)                          # (2,T,Bp,H)

    # torch: x[:, -1, :] of the bidirectional output == [fwd@T-1 | bwd@T-1].
    last = jnp.concatenate([prev[0, -1], prev[1, -1]], axis=-1)[:B]  # (B, 2H)

    # Tiny Linear(2H -> 1) + sigmoid head: left to XLA (lane width 1 would be
    # pure overhead as a Pallas kernel).
    logits = last @ params["w_out"].T + params["b_out"]         # (B, 1)
    return jnp.squeeze(jax.nn.sigmoid(logits))                  # (B,)


# ---------------------------------------------------------------------------
# Deterministic parameter construction (matches torch module shapes)
# ---------------------------------------------------------------------------
def make_params(key, vocab_size, emb_size, hidden_size, num_layers):
    params = {}
    key, k_emb = jax.random.split(key)
    params["embedding"] = jax.random.normal(
        k_emb, (vocab_size, emb_size), dtype=jnp.float32)

    scale = 1.0 / jnp.sqrt(hidden_size)
    for l in range(num_layers):
        in_size = emb_size if l == 0 else 2 * hidden_size
        for direction in ("fwd", "bwd"):
            key, k1, k2, k3, k4 = jax.random.split(key, 5)
            w_ih = jax.random.uniform(k1, (4 * hidden_size, in_size),
                                      minval=-scale, maxval=scale,
                                      dtype=jnp.float32)
            w_hh = jax.random.uniform(k2, (4 * hidden_size, hidden_size),
                                      minval=-scale, maxval=scale,
                                      dtype=jnp.float32)
            b_ih = jax.random.uniform(k3, (4 * hidden_size,),
                                      minval=-scale, maxval=scale,
                                      dtype=jnp.float32)
            b_hh = jax.random.uniform(k4, (4 * hidden_size,),
                                      minval=-scale, maxval=scale,
                                      dtype=jnp.float32)
            params[f"layer{l}_{direction}"] = (w_ih, w_hh, b_ih, b_hh)

    key, k_w, k_b = jax.random.split(key, 3)
    params["w_out"] = jax.random.uniform(k_w, (1, 2 * hidden_size),
                                         minval=-scale, maxval=scale,
                                         dtype=jnp.float32)
    params["b_out"] = jax.random.uniform(k_b, (1,),
                                         minval=-scale, maxval=scale,
                                         dtype=jnp.float32)
    return params


if __name__ == "__main__":
    VOCAB, SEQ, EMB, HIDDEN, LAYERS = 50, 8, 16, 32, 2
    BATCH = 2

    key = jax.random.PRNGKey(0)
    key, k_tok, k_par = jax.random.split(key, 3)
    tokens = jax.random.randint(k_tok, (BATCH, SEQ), 0, VOCAB, dtype=jnp.int32)
    params = make_params(k_par, VOCAB, EMB, HIDDEN, LAYERS)

    fwd = jax.jit(functools.partial(model_forward, num_layers=LAYERS))
    out = fwd(tokens, params)
    jax.block_until_ready(out)

    assert out.shape == (BATCH,), out.shape
    assert bool(jnp.all(jnp.isfinite(out)))
    assert bool(jnp.all((out >= 0.0) & (out <= 1.0)))
    print("KERNEL_OK")
</pallas_src>

<mosaic_0001>
module attributes {stable_mosaic.version = 11 : i64} {
  func.func @lstm_layer_kernel(%arg0: i32, %arg1: memref<1x8x8x128xf32, #tpu.memory_space<vmem>>, %arg2: memref<1x32x128xbf16, #tpu.memory_space<vmem>>, %arg3: memref<1x8x8x32xf32, #tpu.memory_space<vmem>>) attributes {dimension_semantics = [#tpu.dimension_semantics<parallel>], iteration_bounds = array<i64: 2>, scalar_prefetch = 0 : i64, scratch_operands = 0 : i64, tpu.core_type = #tpu.core_type<tc>, window_params = [{transform_indices = @transform_0, window_bounds = array<i64: 1, 8, 8, 128>}, {transform_indices = @transform_1, window_bounds = array<i64: 1, 32, 128>}, {transform_indices = @transform_2, window_bounds = array<i64: 1, 8, 8, 32>}]} {
    %c0 = arith.constant 0 : index
    %c0_0 = arith.constant 0 : index
    %c0_1 = arith.constant 0 : index
    %0 = vector.load %arg2[%c0, %c0_0, %c0_1] : memref<1x32x128xbf16, #tpu.memory_space<vmem>>, vector<1x32x128xbf16>
    %1 = vector.shape_cast %0 : vector<1x32x128xbf16> to vector<32x128xbf16>
    %cst = arith.constant 0.000000e+00 : f32
    %2 = vector.broadcast %cst : f32 to vector<8x32xf32>
    %cst_2 = arith.constant 0.000000e+00 : f32
    %3 = vector.broadcast %cst_2 : f32 to vector<8x32xf32>
    %c0_i32 = arith.constant 0 : i32
    %c0_i32_3 = arith.constant 0 : i32
    %4 = arith.cmpi eq, %arg0, %c0_i32_3 : i32
    %c7_i32 = arith.constant 7 : i32
    %5 = arith.subi %c7_i32, %c0_i32 : i32
    %6 = arith.select %4, %c0_i32, %5 : i32
    %c0_4 = arith.constant 0 : index
    %7 = arith.index_cast %6 : i32 to index
    %c0_5 = arith.constant 0 : index
    %c0_6 = arith.constant 0 : index
    %8 = vector.load %arg1[%c0_4, %7, %c0_5, %c0_6] : memref<1x8x8x128xf32, #tpu.memory_space<vmem>>, vector<1x1x8x128xf32>
    %9 = vector.shape_cast %8 : vector<1x1x8x128xf32> to vector<8x128xf32>
    %10 = arith.truncf %2 : vector<8x32xf32> to vector<8x32xbf16>
    %cst_7 = arith.constant dense<0.000000e+00> : vector<8x128xf32>
    %11 = tpu.matmul %10, %1, %cst_7 {dimension_numbers = #tpu.dot_dimension_numbers<[1], [0], [0], [1], [0, 0, 1, 1], [], []>} : vector<8x32xbf16>, vector<32x128xbf16>, vector<8x128xf32> -> vector<8x128xf32>
    %12 = arith.addf %9, %11 : vector<8x128xf32>
    %13 = vector.extract_strided_slice %12 {offsets = [0, 0], sizes = [8, 32], strides = [1, 1]} : vector<8x128xf32> to vector<8x32xf32>
    %14 = arith.negf %13 : vector<8x32xf32>
    %15 = math.exp %14 : vector<8x32xf32>
    %cst_8 = arith.constant 1.000000e+00 : f32
    %16 = vector.broadcast %cst_8 : f32 to vector<8x32xf32>
    %17 = arith.addf %16, %15 : vector<8x32xf32>
    %18 = arith.divf %16, %17 : vector<8x32xf32>
    %19 = vector.extract_strided_slice %12 {offsets = [0, 32], sizes = [8, 32], strides = [1, 1]} : vector<8x128xf32> to vector<8x32xf32>
    %20 = arith.negf %19 : vector<8x32xf32>
    %21 = math.exp %20 : vector<8x32xf32>
    %cst_9 = arith.constant 1.000000e+00 : f32
    %22 = vector.broadcast %cst_9 : f32 to vector<8x32xf32>
    %23 = arith.addf %22, %21 : vector<8x32xf32>
    %24 = arith.divf %22, %23 : vector<8x32xf32>
    %25 = vector.extract_strided_slice %12 {offsets = [0, 64], sizes = [8, 32], strides = [1, 1]} : vector<8x128xf32> to vector<8x32xf32>
    %26 = math.tanh %25 : vector<8x32xf32>
    %27 = vector.extract_strided_slice %12 {offsets = [0, 96], sizes = [8, 32], strides = [1, 1]} : vector<8x128xf32> to vector<8x32xf32>
    %28 = arith.negf %27 : vector<8x32xf32>
    %29 = math.exp %28 : vector<8x32xf32>
    %cst_10 = arith.constant 1.000000e+00 : f32
    %30 = vector.broadcast %cst_10 : f32 to vector<8x32xf32>
    %31 = arith.addf %30, %29 : vector<8x32xf32>
    %32 = arith.divf %30, %31 : vector<8x32xf32>
    %33 = arith.mulf %24, %3 : vector<8x32xf32>
    %34 = arith.mulf %18, %26 : vector<8x32xf32>
    %35 = arith.addf %33, %34 : vector<8x32xf32>
    %36 = math.tanh %35 : vector<8x32xf32>
    %37 = arith.mulf %32, %36 : vector<8x32xf32>
    %c0_11 = arith.constant 0 : index
    %38 = arith.index_cast %6 : i32 to index
    %c0_12 = arith.constant 0 : index
    %c0_13 = arith.constant 0 : index
    %39 = vector.load %arg3[%c0_11, %38, %c0_12, %c0_13] : memref<1x8x8x32xf32, #tpu.memory_space<vmem>>, vector<1x1x8x32xf32>
    %40 = vector.shape_cast %39 : vector<1x1x8x32xf32> to vector<8x32xf32>
    %41 = vector.shape_cast %37 : vector<8x32xf32> to vector<1x1x8x32xf32>
    tpu.vector_store %arg3[%c0_11, %38, %c0_12, %c0_13], %41 {strides = array<i32>} : memref<1x8x8x32xf32, #tpu.memory_space<vmem>>, vector<1x1x8x32xf32>,
    %c1_i32 = arith.constant 1 : i32
    %c0_i32_14 = arith.constant 0 : i32
    %42 = arith.cmpi eq, %arg0, %c0_i32_14 : i32
    %c7_i32_15 = arith.constant 7 : i32
    %43 = arith.subi %c7_i32_15, %c1_i32 : i32
    %44 = arith.select %42, %c1_i32, %43 : i32
    %c0_16 = arith.constant 0 : index
    %45 = arith.index_cast %44 : i32 to index
    %c0_17 = arith.constant 0 : index
    %c0_18 = arith.constant 0 : index
    %46 = vector.load %arg1[%c0_16, %45, %c0_17, %c0_18] : memref<1x8x8x128xf32, #tpu.memory_space<vmem>>, vector<1x1x8x128xf32>
    %47 = vector.shape_cast %46 : vector<1x1x8x128xf32> to vector<8x128xf32>
    %48 = arith.truncf %37 : vector<8x32xf32> to vector<8x32xbf16>
    %cst_19 = arith.constant dense<0.000000e+00> : vector<8x128xf32>
    %49 = tpu.matmul %48, %1, %cst_19 {dimension_numbers = #tpu.dot_dimension_numbers<[1], [0], [0], [1], [0, 0, 1, 1], [], []>} : vector<8x32xbf16>, vector<32x128xbf16>, vector<8x128xf32> -> vector<8x128xf32>
    %50 = arith.addf %47, %49 : vector<8x128xf32>
    %51 = vector.extract_strided_slice %50 {offsets = [0, 0], sizes = [8, 32], strides = [1, 1]} : vector<8x128xf32> to vector<8x32xf32>
    %52 = arith.negf %51 : vector<8x32xf32>
    %53 = math.exp %52 : vector<8x32xf32>
    %cst_20 = arith.constant 1.000000e+00 : f32
    %54 = vector.broadcast %cst_20 : f32 to vector<8x32xf32>
    %55 = arith.addf %54, %53 : vector<8x32xf32>
    %56 = arith.divf %54, %55 : vector<8x32xf32>
    %57 = vector.extract_strided_slice %50 {offsets = [0, 32], sizes = [8, 32], strides = [1, 1]} : vector<8x128xf32> to vector<8x32xf32>
    %58 = arith.negf %57 : vector<8x32xf32>
    %59 = math.exp %58 : vector<8x32xf32>
    %cst_21 = arith.constant 1.000000e+00 : f32
    %60 = vector.broadcast %cst_21 : f32 to vector<8x32xf32>
    %61 = arith.addf %60, %59 : vector<8x32xf32>
    %62 = arith.divf %60, %61 : vector<8x32xf32>
    %63 = vector.extract_strided_slice %50 {offsets = [0, 64], sizes = [8, 32], strides = [1, 1]} : vector<8x128xf32> to vector<8x32xf32>
    %64 = math.tanh %63 : vector<8x32xf32>
    %65 = vector.extract_strided_slice %50 {offsets = [0, 96], sizes = [8, 32], strides = [1, 1]} : vector<8x128xf32> to vector<8x32xf32>
    %66 = arith.negf %65 : vector<8x32xf32>
    %67 = math.exp %66 : vector<8x32xf32>
    %cst_22 = arith.constant 1.000000e+00 : f32
    %68 = vector.broadcast %cst_22 : f32 to vector<8x32xf32>
    %69 = arith.addf %68, %67 : vector<8x32xf32>
    %70 = arith.divf %68, %69 : vector<8x32xf32>
    %71 = arith.mulf %62, %35 : vector<8x32xf32>
    %72 = arith.mulf %56, %64 : vector<8x32xf32>
    %73 = arith.addf %71, %72 : vector<8x32xf32>
    %74 = math.tanh %73 : vector<8x32xf32>
    %75 = arith.mulf %70, %74 : vector<8x32xf32>
    %c0_23 = arith.constant 0 : index
    %76 = arith.index_cast %44 : i32 to index
    %c0_24 = arith.constant 0 : index
    %c0_25 = arith.constant 0 : index
    %77 = vector.load %arg3[%c0_23, %76, %c0_24, %c0_25] : memref<1x8x8x32xf32, #tpu.memory_space<vmem>>, vector<1x1x8x32xf32>
    %78 = vector.shape_cast %77 : vector<1x1x8x32xf32> to vector<8x32xf32>
    %79 = vector.shape_cast %75 : vector<8x32xf32> to vector<1x1x8x32xf32>
    tpu.vector_store %arg3[%c0_23, %76, %c0_24, %c0_25], %79 {strides = array<i32>} : memref<1x8x8x32xf32, #tpu.memory_space<vmem>>, vector<1x1x8x32xf32>,
    %c2_i32 = arith.constant 2 : i32
    %c0_i32_26 = arith.constant 0 : i32
    %80 = arith.cmpi eq, %arg0, %c0_i32_26 : i32
    %c7_i32_27 = arith.constant 7 : i32
    %81 = arith.subi %c7_i32_27, %c2_i32 : i32
    %82 = arith.select %80, %c2_i32, %81 : i32
    %c0_28 = arith.constant 0 : index
    %83 = arith.index_cast %82 : i32 to index
    %c0_29 = arith.constant 0 : index
    %c0_30 = arith.constant 0 : index
    %84 = vector.load %arg1[%c0_28, %83, %c0_29, %c0_30] : memref<1x8x8x128xf32, #tpu.memory_space<vmem>>, vector<1x1x8x128xf32>
    %85 = vector.shape_cast %84 : vector<1x1x8x128xf32> to vector<8x128xf32>
    %86 = arith.truncf %75 : vector<8x32xf32> to vector<8x32xbf16>
    %cst_31 = arith.constant dense<0.000000e+00> : vector<8x128xf32>
    %87 = tpu.matmul %86, %1, %cst_31 {dimension_numbers = #tpu.dot_dimension_numbers<[1], [0], [0], [1], [0, 0, 1, 1], [], []>} : vector<8x32xbf16>, vector<32x128xbf16>, vector<8x128xf32> -> vector<8x128xf32>
    %88 = arith.addf %85, %87 : vector<8x128xf32>
    %89 = vector.extract_strided_slice %88 {offsets = [0, 0], sizes = [8, 32], strides = [1, 1]} : vector<8x128xf32> to vector<8x32xf32>
    %90 = arith.negf %89 : vector<8x32xf32>
    %91 = math.exp %90 : vector<8x32xf32>
    %cst_32 = arith.constant 1.000000e+00 : f32
    %92 = vector.broadcast %cst_32 : f32 to vector<8x32xf32>
    %93 = arith.addf %92, %91 : vector<8x32xf32>
    %94 = arith.divf %92, %93 : vector<8x32xf32>
    %95 = vector.extract_strided_slice %88 {offsets = [0, 32], sizes = [8, 32], strides = [1, 1]} : vector<8x128xf32> to vector<8x32xf32>
    %96 = arith.negf %95 : vector<8x32xf32>
    %97 = math.exp %96 : vector<8x32xf32>
    %cst_33 = arith.constant 1.000000e+00 : f32
    %98 = vector.broadcast %cst_33 : f32 to vector<8x32xf32>
    %99 = arith.addf %98, %97 : vector<8x32xf32>
    %100 = arith.divf %98, %99 : vector<8x32xf32>
    %101 = vector.extract_strided_slice %88 {offsets = [0, 64], sizes = [8, 32], strides = [1, 1]} : vector<8x128xf32> to vector<8x32xf32>
    %102 = math.tanh %101 : vector<8x32xf32>
    %103 = vector.extract_strided_slice %88 {offsets = [0, 96], sizes = [8, 32], strides = [1, 1]} : vector<8x128xf32> to vector<8x32xf32>
    %104 = arith.negf %103 : vector<8x32xf32>
    %105 = math.exp %104 : vector<8x32xf32>
    %cst_34 = arith.constant 1.000000e+00 : f32
    %106 = vector.broadcast %cst_34 : f32 to vector<8x32xf32>
    %107 = arith.addf %106, %105 : vector<8x32xf32>
    %108 = arith.divf %106, %107 : vector<8x32xf32>
    %109 = arith.mulf %100, %73 : vector<8x32xf32>
    %110 = arith.mulf %94, %102 : vector<8x32xf32>
    %111 = arith.addf %109, %110 : vector<8x32xf32>
    %112 = math.tanh %111 : vector<8x32xf32>
    %113 = arith.mulf %108, %112 : vector<8x32xf32>
    %c0_35 = arith.constant 0 : index
    %114 = arith.index_cast %82 : i32 to index
    %c0_36 = arith.constant 0 : index
    %c0_37 = arith.constant 0 : index
    %115 = vector.load %arg3[%c0_35, %114, %c0_36, %c0_37] : memref<1x8x8x32xf32, #tpu.memory_space<vmem>>, vector<1x1x8x32xf32>
    %116 = vector.shape_cast %115 : vector<1x1x8x32xf32> to vector<8x32xf32>
    %117 = vector.shape_cast %113 : vector<8x32xf32> to vector<1x1x8x32xf32>
    tpu.vector_store %arg3[%c0_35, %114, %c0_36, %c0_37], %117 {strides = array<i32>} : memref<1x8x8x32xf32, #tpu.memory_space<vmem>>, vector<1x1x8x32xf32>,
    %c3_i32 = arith.constant 3 : i32
    %c0_i32_38 = arith.constant 0 : i32
    %118 = arith.cmpi eq, %arg0, %c0_i32_38 : i32
    %c7_i32_39 = arith.constant 7 : i32
    %119 = arith.subi %c7_i32_39, %c3_i32 : i32
    %120 = arith.select %118, %c3_i32, %119 : i32
    %c0_40 = arith.constant 0 : index
    %121 = arith.index_cast %120 : i32 to index
    %c0_41 = arith.constant 0 : index
    %c0_42 = arith.constant 0 : index
    %122 = vector.load %arg1[%c0_40, %121, %c0_41, %c0_42] : memref<1x8x8x128xf32, #tpu.memory_space<vmem>>, vector<1x1x8x128xf32>
    %123 = vector.shape_cast %122 : vector<1x1x8x128xf32> to vector<8x128xf32>
    %124 = arith.truncf %113 : vector<8x32xf32> to vector<8x32xbf16>
    %cst_43 = arith.constant dense<0.000000e+00> : vector<8x128xf32>
    %125 = tpu.matmul %124, %1, %cst_43 {dimension_numbers = #tpu.dot_dimension_numbers<[1], [0], [0], [1], [0, 0, 1, 1], [], []>} : vector<8x32xbf16>, vector<32x128xbf16>, vector<8x128xf32> -> vector<8x128xf32>
    %126 = arith.addf %123, %125 : vector<8x128xf32>
    %127 = vector.extract_strided_slice %126 {offsets = [0, 0], sizes = [8, 32], strides = [1, 1]} : vector<8x128xf32> to vector<8x32xf32>
    %128 = arith.negf %127 : vector<8x32xf32>
    %129 = math.exp %128 : vector<8x32xf32>
    %cst_44 = arith.constant 1.000000e+00 : f32
    %130 = vector.broadcast %cst_44 : f32 to vector<8x32xf32>
    %131 = arith.addf %130, %129 : vector<8x32xf32>
    %132 = arith.divf %130, %131 : vector<8x32xf32>
    %133 = vector.extract_strided_slice %126 {offsets = [0, 32], sizes = [8, 32], strides = [1, 1]} : vector<8x128xf32> to vector<8x32xf32>
    %134 = arith.negf %133 : vector<8x32xf32>
    %135 = math.exp %134 : vector<8x32xf32>
    %cst_45 = arith.constant 1.000000e+00 : f32
    %136 = vector.broadcast %cst_45 : f32 to vector<8x32xf32>
    %137 = arith.addf %136, %135 : vector<8x32xf32>
    %138 = arith.divf %136, %137 : vector<8x32xf32>
    %139 = vector.extract_strided_slice %126 {offsets = [0, 64], sizes = [8, 32], strides = [1, 1]} : vector<8x128xf32> to vector<8x32xf32>
    %140 = math.tanh %139 : vector<8x32xf32>
    %141 = vector.extract_strided_slice %126 {offsets = [0, 96], sizes = [8, 32], strides = [1, 1]} : vector<8x128xf32> to vector<8x32xf32>
    %142 = arith.negf %141 : vector<8x32xf32>
    %143 = math.exp %142 : vector<8x32xf32>
    %cst_46 = arith.constant 1.000000e+00 : f32
    %144 = vector.broadcast %cst_46 : f32 to vector<8x32xf32>
    %145 = arith.addf %144, %143 : vector<8x32xf32>
    %146 = arith.divf %144, %145 : vector<8x32xf32>
    %147 = arith.mulf %138, %111 : vector<8x32xf32>
    %148 = arith.mulf %132, %140 : vector<8x32xf32>
    %149 = arith.addf %147, %148 : vector<8x32xf32>
    %150 = math.tanh %149 : vector<8x32xf32>
    %151 = arith.mulf %146, %150 : vector<8x32xf32>
    %c0_47 = arith.constant 0 : index
    %152 = arith.index_cast %120 : i32 to index
    %c0_48 = arith.constant 0 : index
    %c0_49 = arith.constant 0 : index
    %153 = vector.load %arg3[%c0_47, %152, %c0_48, %c0_49] : memref<1x8x8x32xf32, #tpu.memory_space<vmem>>, vector<1x1x8x32xf32>
    %154 = vector.shape_cast %153 : vector<1x1x8x32xf32> to vector<8x32xf32>
    %155 = vector.shape_cast %151 : vector<8x32xf32> to vector<1x1x8x32xf32>
    tpu.vector_store %arg3[%c0_47, %152, %c0_48, %c0_49], %155 {strides = array<i32>} : memref<1x8x8x32xf32, #tpu.memory_space<vmem>>, vector<1x1x8x32xf32>,
    %c4_i32 = arith.constant 4 : i32
    %c0_i32_50 = arith.constant 0 : i32
    %156 = arith.cmpi eq, %arg0, %c0_i32_50 : i32
    %c7_i32_51 = arith.constant 7 : i32
    %157 = arith.subi %c7_i32_51, %c4_i32 : i32
    %158 = arith.select %156, %c4_i32, %157 : i32
    %c0_52 = arith.constant 0 : index
    %159 = arith.index_cast %158 : i32 to index
    %c0_53 = arith.constant 0 : index
    %c0_54 = arith.constant 0 : index
    %160 = vector.load %arg1[%c0_52, %159, %c0_53, %c0_54] : memref<1x8x8x128xf32, #tpu.memory_space<vmem>>, vector<1x1x8x128xf32>
    %161 = vector.shape_cast %160 : vector<1x1x8x128xf32> to vector<8x128xf32>
    %162 = arith.truncf %151 : vector<8x32xf32> to vector<8x32xbf16>
    %cst_55 = arith.constant dense<0.000000e+00> : vector<8x128xf32>
    %163 = tpu.matmul %162, %1, %cst_55 {dimension_numbers = #tpu.dot_dimension_numbers<[1], [0], [0], [1], [0, 0, 1, 1], [], []>} : vector<8x32xbf16>, vector<32x128xbf16>, vector<8x128xf32> -> vector<8x128xf32>
    %164 = arith.addf %161, %163 : vector<8x128xf32>
    %165 = vector.extract_strided_slice %164 {offsets = [0, 0], sizes = [8, 32], strides = [1, 1]} : vector<8x128xf32> to vector<8x32xf32>
    %166 = arith.negf %165 : vector<8x32xf32>
    %167 = math.exp %166 : vector<8x32xf32>
    %cst_56 = arith.constant 1.000000e+00 : f32
    %168 = vector.broadcast %cst_56 : f32 to vector<8x32xf32>
    %169 = arith.addf %168, %167 : vector<8x32xf32>
    %170 = arith.divf %168, %169 : vector<8x32xf32>
    %171 = vector.extract_strided_slice %164 {offsets = [0, 32], sizes = [8, 32], strides = [1, 1]} : vector<8x128xf32> to vector<8x32xf32>
    %172 = arith.negf %171 : vector<8x32xf32>
    %173 = math.exp %172 : vector<8x32xf32>
    %cst_57 = arith.constant 1.000000e+00 : f32
    %174 = vector.broadcast %cst_57 : f32 to vector<8x32xf32>
    %175 = arith.addf %174, %173 : vector<8x32xf32>
    %176 = arith.divf %174, %175 : vector<8x32xf32>
    %177 = vector.extract_strided_slice %164 {offsets = [0, 64], sizes = [8, 32], strides = [1, 1]} : vector<8x128xf32> to vector<8x32xf32>
    %178 = math.tanh %177 : vector<8x32xf32>
    %179 = vector.extract_strided_slice %164 {offsets = [0, 96], sizes = [8, 32], strides = [1, 1]} : vector<8x128xf32> to vector<8x32xf32>
    %180 = arith.negf %179 : vector<8x32xf32>
    %181 = math.exp %180 : vector<8x32xf32>
    %cst_58 = arith.constant 1.000000e+00 : f32
    %182 = vector.broadcast %cst_58 : f32 to vector<8x32xf32>
    %183 = arith.addf %182, %181 : vector<8x32xf32>
    %184 = arith.divf %182, %183 : vector<8x32xf32>
    %185 = arith.mulf %176, %149 : vector<8x32xf32>
    %186 = arith.mulf %170, %178 : vector<8x32xf32>
    %187 = arith.addf %185, %186 : vector<8x32xf32>
    %188 = math.tanh %187 : vector<8x32xf32>
    %189 = arith.mulf %184, %188 : vector<8x32xf32>
    %c0_59 = arith.constant 0 : index
    %190 = arith.index_cast %158 : i32 to index
    %c0_60 = arith.constant 0 : index
    %c0_61 = arith.constant 0 : index
    %191 = vector.load %arg3[%c0_59, %190, %c0_60, %c0_61] : memref<1x8x8x32xf32, #tpu.memory_space<vmem>>, vector<1x1x8x32xf32>
    %192 = vector.shape_cast %191 : vector<1x1x8x32xf32> to vector<8x32xf32>
    %193 = vector.shape_cast %189 : vector<8x32xf32> to vector<1x1x8x32xf32>
    tpu.vector_store %arg3[%c0_59, %190, %c0_60, %c0_61], %193 {strides = array<i32>} : memref<1x8x8x32xf32, #tpu.memory_space<vmem>>, vector<1x1x8x32xf32>,
    %c5_i32 = arith.constant 5 : i32
    %c0_i32_62 = arith.constant 0 : i32
    %194 = arith.cmpi eq, %arg0, %c0_i32_62 : i32
    %c7_i32_63 = arith.constant 7 : i32
    %195 = arith.subi %c7_i32_63, %c5_i32 : i32
    %196 = arith.select %194, %c5_i32, %195 : i32
    %c0_64 = arith.constant 0 : index
    %197 = arith.index_cast %196 : i32 to index
    %c0_65 = arith.constant 0 : index
    %c0_66 = arith.constant 0 : index
    %198 = vector.load %arg1[%c0_64, %197, %c0_65, %c0_66] : memref<1x8x8x128xf32, #tpu.memory_space<vmem>>, vector<1x1x8x128xf32>
    %199 = vector.shape_cast %198 : vector<1x1x8x128xf32> to vector<8x128xf32>
    %200 = arith.truncf %189 : vector<8x32xf32> to vector<8x32xbf16>
    %cst_67 = arith.constant dense<0.000000e+00> : vector<8x128xf32>
    %201 = tpu.matmul %200, %1, %cst_67 {dimension_numbers = #tpu.dot_dimension_numbers<[1], [0], [0], [1], [0, 0, 1, 1], [], []>} : vector<8x32xbf16>, vector<32x128xbf16>, vector<8x128xf32> -> vector<8x128xf32>
    %202 = arith.addf %199, %201 : vector<8x128xf32>
    %203 = vector.extract_strided_slice %202 {offsets = [0, 0], sizes = [8, 32], strides = [1, 1]} : vector<8x128xf32> to vector<8x32xf32>
    %204 = arith.negf %203 : vector<8x32xf32>
    %205 = math.exp %204 : vector<8x32xf32>
    %cst_68 = arith.constant 1.000000e+00 : f32
    %206 = vector.broadcast %cst_68 : f32 to vector<8x32xf32>
    %207 = arith.addf %206, %205 : vector<8x32xf32>
    %208 = arith.divf %206, %207 : vector<8x32xf32>
    %209 = vector.extract_strided_slice %202 {offsets = [0, 32], sizes = [8, 32], strides = [1, 1]} : vector<8x128xf32> to vector<8x32xf32>
    %210 = arith.negf %209 : vector<8x32xf32>
    %211 = math.exp %210 : vector<8x32xf32>
    %cst_69 = arith.constant 1.000000e+00 : f32
    %212 = vector.broadcast %cst_69 : f32 to vector<8x32xf32>
    %213 = arith.addf %212, %211 : vector<8x32xf32>
    %214 = arith.divf %212, %213 : vector<8x32xf32>
    %215 = vector.extract_strided_slice %202 {offsets = [0, 64], sizes = [8, 32], strides = [1, 1]} : vector<8x128xf32> to vector<8x32xf32>
    %216 = math.tanh %215 : vector<8x32xf32>
    %217 = vector.extract_strided_slice %202 {offsets = [0, 96], sizes = [8, 32], strides = [1, 1]} : vector<8x128xf32> to vector<8x32xf32>
    %218 = arith.negf %217 : vector<8x32xf32>
    %219 = math.exp %218 : vector<8x32xf32>
    %cst_70 = arith.constant 1.000000e+00 : f32
    %220 = vector.broadcast %cst_70 : f32 to vector<8x32xf32>
    %221 = arith.addf %220, %219 : vector<8x32xf32>
    %222 = arith.divf %220, %221 : vector<8x32xf32>
    %223 = arith.mulf %214, %187 : vector<8x32xf32>
    %224 = arith.mulf %208, %216 : vector<8x32xf32>
    %225 = arith.addf %223, %224 : vector<8x32xf32>
    %226 = math.tanh %225 : vector<8x32xf32>
    %227 = arith.mulf %222, %226 : vector<8x32xf32>
    %c0_71 = arith.constant 0 : index
    %228 = arith.index_cast %196 : i32 to index
    %c0_72 = arith.constant 0 : index
    %c0_73 = arith.constant 0 : index
    %229 = vector.load %arg3[%c0_71, %228, %c0_72, %c0_73] : memref<1x8x8x32xf32, #tpu.memory_space<vmem>>, vector<1x1x8x32xf32>
    %230 = vector.shape_cast %229 : vector<1x1x8x32xf32> to vector<8x32xf32>
    %231 = vector.shape_cast %227 : vector<8x32xf32> to vector<1x1x8x32xf32>
    tpu.vector_store %arg3[%c0_71, %228, %c0_72, %c0_73], %231 {strides = array<i32>} : memref<1x8x8x32xf32, #tpu.memory_space<vmem>>, vector<1x1x8x32xf32>,
    %c6_i32 = arith.constant 6 : i32
    %c0_i32_74 = arith.constant 0 : i32
    %232 = arith.cmpi eq, %arg0, %c0_i32_74 : i32
    %c7_i32_75 = arith.constant 7 : i32
    %233 = arith.subi %c7_i32_75, %c6_i32 : i32
    %234 = arith.select %232, %c6_i32, %233 : i32
    %c0_76 = arith.constant 0 : index
    %235 = arith.index_cast %234 : i32 to index
    %c0_77 = arith.constant 0 : index
    %c0_78 = arith.constant 0 : index
    %236 = vector.load %arg1[%c0_76, %235, %c0_77, %c0_78] : memref<1x8x8x128xf32, #tpu.memory_space<vmem>>, vector<1x1x8x128xf32>
    %237 = vector.shape_cast %236 : vector<1x1x8x128xf32> to vector<8x128xf32>
    %238 = arith.truncf %227 : vector<8x32xf32> to vector<8x32xbf16>
    %cst_79 = arith.constant dense<0.000000e+00> : vector<8x128xf32>
    %239 = tpu.matmul %238, %1, %cst_79 {dimension_numbers = #tpu.dot_dimension_numbers<[1], [0], [0], [1], [0, 0, 1, 1], [], []>} : vector<8x32xbf16>, vector<32x128xbf16>, vector<8x128xf32> -> vector<8x128xf32>
    %240 = arith.addf %237, %239 : vector<8x128xf32>
    %241 = vector.extract_strided_slice %240 {offsets = [0, 0], sizes = [8, 32], strides = [1, 1]} : vector<8x128xf32> to vector<8x32xf32>
    %242 = arith.negf %241 : vector<8x32xf32>
    %243 = math.exp %242 : vector<8x32xf32>
    %cst_80 = arith.constant 1.000000e+00 : f32
    %244 = vector.broadcast %cst_80 : f32 to vector<8x32xf32>
    %245 = arith.addf %244, %243 : vector<8x32xf32>
    %246 = arith.divf %244, %245 : vector<8x32xf32>
    %247 = vector.extract_strided_slice %240 {offsets = [0, 32], sizes = [8, 32], strides = [1, 1]} : vector<8x128xf32> to vector<8x32xf32>
    %248 = arith.negf %247 : vector<8x32xf32>
    %249 = math.exp %248 : vector<8x32xf32>
    %cst_81 = arith.constant 1.000000e+00 : f32
    %250 = vector.broadcast %cst_81 : f32 to vector<8x32xf32>
    %251 = arith.addf %250, %249 : vector<8x32xf32>
    %252 = arith.divf %250, %251 : vector<8x32xf32>
    %253 = vector.extract_strided_slice %240 {offsets = [0, 64], sizes = [8, 32], strides = [1, 1]} : vector<8x128xf32> to vector<8x32xf32>
    %254 = math.tanh %253 : vector<8x32xf32>
    %255 = vector.extract_strided_slice %240 {offsets = [0, 96], sizes = [8, 32], strides = [1, 1]} : vector<8x128xf32> to vector<8x32xf32>
    %256 = arith.negf %255 : vector<8x32xf32>
    %257 = math.exp %256 : vector<8x32xf32>
    %cst_82 = arith.constant 1.000000e+00 : f32
    %258 = vector.broadcast %cst_82 : f32 to vector<8x32xf32>
    %259 = arith.addf %258, %257 : vector<8x32xf32>
    %260 = arith.divf %258, %259 : vector<8x32xf32>
    %261 = arith.mulf %252, %225 : vector<8x32xf32>
    %262 = arith.mulf %246, %254 : vector<8x32xf32>
    %263 = arith.addf %261, %262 : vector<8x32xf32>
    %264 = math.tanh %263 : vector<8x32xf32>
    %265 = arith.mulf %260, %264 : vector<8x32xf32>
    %c0_83 = arith.constant 0 : index
    %266 = arith.index_cast %234 : i32 to index
    %c0_84 = arith.constant 0 : index
    %c0_85 = arith.constant 0 : index
    %267 = vector.load %arg3[%c0_83, %266, %c0_84, %c0_85] : memref<1x8x8x32xf32, #tpu.memory_space<vmem>>, vector<1x1x8x32xf32>
    %268 = vector.shape_cast %267 : vector<1x1x8x32xf32> to vector<8x32xf32>
    %269 = vector.shape_cast %265 : vector<8x32xf32> to vector<1x1x8x32xf32>
    tpu.vector_store %arg3[%c0_83, %266, %c0_84, %c0_85], %269 {strides = array<i32>} : memref<1x8x8x32xf32, #tpu.memory_space<vmem>>, vector<1x1x8x32xf32>,
    %c7_i32_86 = arith.constant 7 : i32
    %c0_i32_87 = arith.constant 0 : i32
    %270 = arith.cmpi eq, %arg0, %c0_i32_87 : i32
    %c7_i32_88 = arith.constant 7 : i32
    %271 = arith.subi %c7_i32_88, %c7_i32_86 : i32
    %272 = arith.select %270, %c7_i32_86, %271 : i32
    %c0_89 = arith.constant 0 : index
    %273 = arith.index_cast %272 : i32 to index
    %c0_90 = arith.constant 0 : index
    %c0_91 = arith.constant 0 : index
    %274 = vector.load %arg1[%c0_89, %273, %c0_90, %c0_91] : memref<1x8x8x128xf32, #tpu.memory_space<vmem>>, vector<1x1x8x128xf32>
    %275 = vector.shape_cast %274 : vector<1x1x8x128xf32> to vector<8x128xf32>
    %276 = arith.truncf %265 : vector<8x32xf32> to vector<8x32xbf16>
    %cst_92 = arith.constant dense<0.000000e+00> : vector<8x128xf32>
    %277 = tpu.matmul %276, %1, %cst_92 {dimension_numbers = #tpu.dot_dimension_numbers<[1], [0], [0], [1], [0, 0, 1, 1], [], []>} : vector<8x32xbf16>, vector<32x128xbf16>, vector<8x128xf32> -> vector<8x128xf32>
    %278 = arith.addf %275, %277 : vector<8x128xf32>
    %279 = vector.extract_strided_slice %278 {offsets = [0, 0], sizes = [8, 32], strides = [1, 1]} : vector<8x128xf32> to vector<8x32xf32>
    %280 = arith.negf %279 : vector<8x32xf32>
    %281 = math.exp %280 : vector<8x32xf32>
    %cst_93 = arith.constant 1.000000e+00 : f32
    %282 = vector.broadcast %cst_93 : f32 to vector<8x32xf32>
    %283 = arith.addf %282, %281 : vector<8x32xf32>
    %284 = arith.divf %282, %283 : vector<8x32xf32>
    %285 = vector.extract_strided_slice %278 {offsets = [0, 32], sizes = [8, 32], strides = [1, 1]} : vector<8x128xf32> to vector<8x32xf32>
    %286 = arith.negf %285 : vector<8x32xf32>
    %287 = math.exp %286 : vector<8x32xf32>
    %cst_94 = arith.constant 1.000000e+00 : f32
    %288 = vector.broadcast %cst_94 : f32 to vector<8x32xf32>
    %289 = arith.addf %288, %287 : vector<8x32xf32>
    %290 = arith.divf %288, %289 : vector<8x32xf32>
    %291 = vector.extract_strided_slice %278 {offsets = [0, 64], sizes = [8, 32], strides = [1, 1]} : vector<8x128xf32> to vector<8x32xf32>
    %292 = math.tanh %291 : vector<8x32xf32>
    %293 = vector.extract_strided_slice %278 {offsets = [0, 96], sizes = [8, 32], strides = [1, 1]} : vector<8x128xf32> to vector<8x32xf32>
    %294 = arith.negf %293 : vector<8x32xf32>
    %295 = math.exp %294 : vector<8x32xf32>
    %cst_95 = arith.constant 1.000000e+00 : f32
    %296 = vector.broadcast %cst_95 : f32 to vector<8x32xf32>
    %297 = arith.addf %296, %295 : vector<8x32xf32>
    %298 = arith.divf %296, %297 : vector<8x32xf32>
    %299 = arith.mulf %290, %263 : vector<8x32xf32>
    %300 = arith.mulf %284, %292 : vector<8x32xf32>
    %301 = arith.addf %299, %300 : vector<8x32xf32>
    %302 = math.tanh %301 : vector<8x32xf32>
    %303 = arith.mulf %298, %302 : vector<8x32xf32>
    %c0_96 = arith.constant 0 : index
    %304 = arith.index_cast %272 : i32 to index
    %c0_97 = arith.constant 0 : index
    %c0_98 = arith.constant 0 : index
    %305 = vector.load %arg3[%c0_96, %304, %c0_97, %c0_98] : memref<1x8x8x32xf32, #tpu.memory_space<vmem>>, vector<1x1x8x32xf32>
    %306 = vector.shape_cast %305 : vector<1x1x8x32xf32> to vector<8x32xf32>
    %307 = vector.shape_cast %303 : vector<8x32xf32> to vector<1x1x8x32xf32>
    tpu.vector_store %arg3[%c0_96, %304, %c0_97, %c0_98], %307 {strides = array<i32>} : memref<1x8x8x32xf32, #tpu.memory_space<vmem>>, vector<1x1x8x32xf32>,
    %c8_i32 = arith.constant 8 : i32
    return
  }
  func.func @transform_0(%arg0: i32) -> (i32, i32, i32, i32) {
    %c0_i32 = arith.constant 0 : i32
    %c0_i32_0 = arith.constant 0 : i32
    %c0_i32_1 = arith.constant 0 : i32
    %c0_i32_2 = arith.constant 0 : i32
    return %arg0, %c0_i32, %c0_i32_0, %c0_i32_1 : i32, i32, i32, i32
  }
  func.func @transform_1(%arg0: i32) -> (i32, i32, i32) {
    %c0_i32 = arith.constant 0 : i32
    %c0_i32_0 = arith.constant 0 : i32
    %c0_i32_1 = arith.constant 0 : i32
    return %arg0, %c0_i32, %c0_i32_0 : i32, i32, i32
  }
  func.func @transform_2(%arg0: i32) -> (i32, i32, i32, i32) {
    %c0_i32 = arith.constant 0 : i32
    %c0_i32_0 = arith.constant 0 : i32
    %c0_i32_1 = arith.constant 0 : i32
    %c0_i32_2 = arith.constant 0 : i32
    return %arg0, %c0_i32, %c0_i32_0, %c0_i32_1 : i32, i32, i32, i32
  }
}

</mosaic_0001>

<bundles_post_ra>
// kernel: model_forward.2
= control target key start
LH: loop header
LB: loop body
LE: loop exit
PB: predicated region body
PF: predicated region fallthrough
CT: control target
= control target key end

     0   :  { %s1170_s9 = smov 0   ;;  %s1431_s0 = inlined_call_operand.vmem [shape: f32[2,8,8,128], index: 0, kind: input, shape index: {}]   ;;  %s1432_s1 = inlined_call_operand.vmem [shape: bf16[2,32,128], index: 1, kind: input, shape index: {}]   ;;  %s1433_s2 = inlined_call_operand.vmem [shape: f32[2,8,8,32], index: 2, kind: output, shape index: {}]  }
   0x1 LB: > { %s1176_s10 = sadd.s32 4294967295, %s1148_s9   ;;  %p938_p0 = scmp.ge.s32.totalorder %s1148_s9, 1  ;;  %s1148_s9 = sphi %s1170_s9, %s12_s9  }
   0x2   : > { %p122_p1 = scmp.lt.s32.totalorder %s1148_s9, 3 }
   0x4   : > { %p123_p2 = pnand %p938_p0, %p122_p1 }
   0x5   : > { %p149_p3 = scmp.lt.s32.totalorder (!%p123_p2), %s1176_s10, 1  ;;  %v1150_v0 = vmov (!%p123_p2), 0.0   ;;  %vm1151_vm0 = vmmov (!%p123_p2), 0   ;;  %v1152_v3 = vmov (!%p123_p2), 0   ;;  %p169_p4 = scmp.eq.s32.totalorder (!%p123_p2), %s1176_s10, 0  ;;  %vm186_vm1 = vcmask (!%p123_p2), 261120  }
   0x6   : > { %126 = sbr.rel (%p123_p2) target bundleno = 5656 (0x1618), region = 28  ;;  %999 = vmatprep.subr.bf16.mxu0 (!%p123_p2), %v1150_v0  ;;  %1003 = vmatprep.mubr.msk.bf16.mxu0 (!%p123_p2), %vm1151_vm0, %v1150_v0  ;;  %s1153_s23 = smov (!%p123_p2), 64  }
   0x7   : > { %1007 = vmatprep.subr.bf16.mxu1 (!%p123_p2), %v1150_v0  ;;  %1011 = vmatprep.mubr.msk.bf16.mxu1 (!%p123_p2), %vm1151_vm0, %v1150_v0  ;;  %s1154_s24 = smov (!%p123_p2), 32  }
   0xd   : > { %s1185_s11 = scalar_select %p149_p3, %s1176_s10, 1 }
   0xe   : > { %s1215_s16 = scalar_select %p169_p4, 0, 7 }
   0xf   : > { %s973_s12 = sshll.u32 %s1185_s11, 4  ;;  %s972_s17 = sshll.u32 %s1185_s11, 6 }
  0x10   : > { %s158_s15 = scalar_lea.vmem %s1432_s1, %s973_s12  ;;  %s1223_s20 = scalar_lea.vmem %s1431_s0, %s972_s17 }
  0x11   : > { %v1194_v1 = vld [vmem:[%s158_s15] sm:$0xff]   ;;  %v1197_v2 = vld [vmem:[%s158_s15 + $0x8] sm:$0xff]   ;;  %s945_s21 = sshll.u32 %s1215_s16, 3 }
  0x12   : > { %1000 = vmatpush3.bf16.msra.mxu0 %v1194_v1  ;;  %1008 = vmatpush3.bf16.msra.mxu1 %v1194_v1  ;;  %s172_s22 = scalar_lea.vmem %s1223_s20, %s945_s21 }
  0x13   : > { %1001 = vmatprep.subr.bf16.mxu0 %v1150_v0  ;;  %1009 = vmatprep.subr.bf16.mxu1 %v1150_v0  ;;  %v173_v4 = vld [vmem:[%s172_s22] sm:$0xff]  ;;  %s1246_s25 = scalar_select %p169_p4, 1, 6 }
  0x14   : > { %s1269_s28 = scalar_select %p169_p4, 2, 5 }
  0x15   : > { %s949_s26 = sshll.u32 %s1246_s25, 3 }
  0x16   : > { %1002 = vmatpush3.bf16.msra.mxu0 %v1197_v2  ;;  %1010 = vmatpush3.bf16.msra.mxu1 %v1197_v2  ;;  %s263_s27 = scalar_lea.vmem %s1223_s20, %s949_s26  ;;  %s952_s29 = sshll.u32 %s1269_s28, 3 }
  0x17   : > { %1015 = vmatprep.subr.bf16.mxu0 %v1150_v0  ;;  %1023 = vmatprep.subr.bf16.mxu1 %v1150_v0  ;;  %v264_v25 = vld [vmem:[%s263_s27] sm:$0xff]  ;;  %s345_s30 = scalar_lea.vmem %s1223_s20, %s952_s29 }
  0x18   : > { %v346_v46 = vld [vmem:[%s345_s30] sm:$0xff]  ;;  %s1292_s3 = scalar_select %p169_p4, 3, 4 }
  0x19   : > { %1004 = vmatmul.mubr.bf16.vlgmr.msra.gmra.mrb[0].mxu0 %v1152_v3  ;;  %s1314_s6 = scalar_select %p169_p4, 4, 3 }
  0x1a   : > { %1016 = vmatpush3.bf16.msra.mxu0 %v1194_v1  ;;  %1019 = vmatprep.mubr.msk.bf16.mxu0 %vm1151_vm0, %v1150_v0  ;;  %s955_s4 = sshll.u32 %s1292_s3, 3 }
  0x1b   : > { %1017 = vmatprep.subr.bf16.mxu0 %v1150_v0  ;;  %s427_s5 = scalar_lea.vmem %s1223_s20, %s955_s4  ;;  %s958_s7 = sshll.u32 %s1314_s6, 3 }
  0x1c   : > { %s509_s8 = scalar_lea.vmem %s1223_s20, %s958_s7 }
  0x1d   : > { %s1336_s12 = scalar_select %p169_p4, 5, 2 }
  0x1e   : > { %1018 = vmatpush3.bf16.msra.mxu0 %v1197_v2  ;;  %s1353_s15 = scalar_select %p169_p4, 6, 1 }
  0x1f   : > { %1031 = vmatprep.subr.bf16.mxu0 %v1150_v0  ;;  %s961_s13 = sshll.u32 %s1336_s12, 3 }
  0x20   : > { %s591_s14 = scalar_lea.vmem %s1223_s20, %s961_s13  ;;  %s964_s18 = sshll.u32 %s1353_s15, 3 }
  0x21   : > { %s673_s19 = scalar_lea.vmem %s1223_s20, %s964_s18 }
  0x22   : > { %s1366_s22 = scalar_select %p169_p4, 7, 0 }
  0x24   : > { %s967_s27 = sshll.u32 %s1366_s22, 3 }
  0x25   : > { %s755_s30 = scalar_lea.vmem %s1223_s20, %s967_s27 }
  0xec   : > { %v224_v5 = vpop.f32.mrb[0].mxu0 }
  0xed   : > { %v230_v6 = vadd.f32 %v224_v5, %v173_v4  ;;  %v1005_v7 = vpop.f32.mrb[1].mxu0 }
  0xee   : > { %v227_v8 = vpop.f32.mrb[2].mxu0 }
  0xef   : > { %1078 = vtanh.f32 %v230_v6  ;;  %v1006_v9 = vpop.f32.mrb[3].mxu0  ;;  %v948_v11 = vmul.f32 -1.442695, %v230_v6  ;;  %v428_v6 = vld [vmem:[%s427_s5] sm:$0xff]  ;;  %s1386_s5 = scalar_lea.vmem %s1433_s2, %s972_s17 }
  0xf0   : > { %s341_s11 = scalar_lea.vmem %s1386_s5, %s949_s26  ;;  %s423_s16 = scalar_lea.vmem %s1386_s5, %s952_s29 }
  0xf1   : > { %1080 = vpow2.f32 %v948_v11  ;;  %s505_s17 = scalar_lea.vmem %s1386_s5, %s955_s4  ;;  %s833_s25 = scalar_lea.vmem %s1386_s5, %s967_s27 }
  0xf9   : > { %v1079_v10 = vpop.eup %1078 }
  0xfa   : > { %240 = vrot.lane.b32.xlu0 %v1079_v10, %s1153_s23 }
  0xfb   : > { %v1081_v12 = vpop.eup %1080 }
  0xfc   : > { %v234_v13 = vadd.f32 1.0, %v1081_v12 }
  0xfe   : > { %1082 = vrcp.f32 %v234_v13 }
 0x108   : > { %v1083_v14 = vpop.eup %1082 }
 0x109   : > { %v238_v17 = vmul.f32 0.0, %v1083_v14 }
 0x16c   : > { %v241_v15 = vpop.permute.xlu0 %240 }
 0x16d   : > { %v243_v16 = vmul.f32 %v1083_v14, %v241_v15 }
 0x16f   : > { %245 = vrot.lane.b32.xlu0 %v243_v16, %s1154_s24 }
 0x1e1   : > { %v246_v18 = vpop.permute.xlu0 %245 }
 0x1e2   : > { %v248_v19 = vadd.f32 %v246_v18, %v238_v17 }
 0x1e4   : > { %1084 = vtanh.f32 %v248_v19 }
 0x1ee   : > { %v1085_v20 = vpop.eup %1084 }
 0x1ef   : > { %251 = vrot.lane.b32.xlu1 %v1085_v20, %s1153_s23 }
 0x261   : > { %v252_v21 = vpop.permute.xlu1 %251 }
 0x262   : > { %v1232_v22 = vmul.f32 %v1083_v14, %v252_v21 }
 0x264   : > { %v265_v23 = vpack.c.bf16 %v1232_v22, %v1232_v22 }
 0x266   : > { %267 = vrot.lane.b32.xlu1 %v265_v23, %s1154_s24 }
 0x2d8   : > { %v268_v24 = vpop.permute.xlu1 %267 }
 0x2d9   : > { %1012 = vmatmul.mubr.msk.bf16.vlgmr.msra.gmra.mrb[0].mxu1 %vm186_vm1, %v268_v24 }
 0x2da   : > { %1024 = vmatpush3.bf16.msra.mxu1 %v1194_v1  ;;  %1027 = vmatprep.mubr.msk.bf16.mxu1 %vm1151_vm0, %v1150_v0 }
 0x2db   : > { %1025 = vmatprep.subr.bf16.mxu1 %v1150_v0 }
 0x2de   : > { %1026 = vmatpush3.bf16.msra.mxu1 %v1197_v2 }
 0x2df   : > { %1039 = vmatprep.subr.bf16.mxu1 %v1150_v0 }
 0x3ac   : > { %v306_v26 = vpop.f32.mrb[0].mxu1 }
 0x3ad   : > { %v312_v27 = vadd.f32 %v306_v26, %v264_v25  ;;  %v1013_v28 = vpop.f32.mrb[1].mxu1 }
 0x3ae   : > { %v309_v29 = vpop.f32.mrb[2].mxu1  ;;  %v510_v28 = vld [vmem:[%s509_s8] sm:$0xff]  ;;  %s259_s8 = scalar_lea.vmem %s1386_s5, %s945_s21  ;;  %s587_s21 = scalar_lea.vmem %s1386_s5, %s958_s7 }
 0x3af   : > { %1086 = vtanh.f32 %v312_v27  ;;  %v1014_v30 = vpop.f32.mrb[3].mxu1  ;;  %v951_v32 = vmul.f32 -1.442695, %v312_v27 }
 0x3b1   : > { %1088 = vpow2.f32 %v951_v32 }
 0x3b9   : > { %v1087_v31 = vpop.eup %1086 }
 0x3ba   : > { %322 = vrot.lane.b32.xlu0 %v1087_v31, %s1153_s23 }
 0x3bb   : > { %v1089_v33 = vpop.eup %1088 }
 0x3bc   : > { %v316_v34 = vadd.f32 1.0, %v1089_v33 }
 0x3be   : > { %1090 = vrcp.f32 %v316_v34 }
 0x3c8   : > { %v1091_v35 = vpop.eup %1090 }
 0x3c9   : > { %v320_v38 = vmul.f32 %v1091_v35, %v248_v19 }
 0x42c   : > { %v323_v36 = vpop.permute.xlu0 %322 }
 0x42d   : > { %v325_v37 = vmul.f32 %v1091_v35, %v323_v36 }
 0x42f   : > { %327 = vrot.lane.b32.xlu1 %v325_v37, %s1154_s24 }
 0x4a1   : > { %v328_v39 = vpop.permute.xlu1 %327 }
 0x4a2   : > { %v330_v40 = vadd.f32 %v328_v39, %v320_v38 }
 0x4a4   : > { %1092 = vtanh.f32 %v330_v40 }
 0x4ae   : > { %v1093_v41 = vpop.eup %1092 }
 0x4af   : > { %333 = vrot.lane.b32.xlu0 %v1093_v41, %s1153_s23 }
 0x521   : > { %v334_v42 = vpop.permute.xlu0 %333 }
 0x522   : > { %v1255_v43 = vmul.f32 %v1091_v35, %v334_v42 }
 0x524   : > { %v347_v44 = vpack.c.bf16 %v1255_v43, %v1255_v43 }
 0x526   : > { %349 = vrot.lane.b32.xlu1 %v347_v44, %s1154_s24 }
 0x598   : > { %v350_v45 = vpop.permute.xlu1 %349 }
 0x599   : > { %1020 = vmatmul.mubr.msk.bf16.vlgmr.msra.gmra.mrb[4].mxu0 %vm186_vm1, %v350_v45 }
 0x59a   : > { %1032 = vmatpush3.bf16.msra.mxu0 %v1194_v1  ;;  %1035 = vmatprep.mubr.msk.bf16.mxu0 %vm1151_vm0, %v1150_v0 }
 0x59b   : > { %1033 = vmatprep.subr.bf16.mxu0 %v1150_v0 }
 0x59e   : > { %1034 = vmatpush3.bf16.msra.mxu0 %v1197_v2 }
 0x59f   : > { %1047 = vmatprep.subr.bf16.mxu0 %v1150_v0 }
 0x66c   : > { %v388_v47 = vpop.f32.mrb[4].mxu0 }
 0x66d   : > { %v394_v48 = vadd.f32 %v388_v47, %v346_v46  ;;  %v1021_v49 = vpop.f32.mrb[5].mxu0 }
 0x66e   : > { %v391_v50 = vpop.f32.mrb[6].mxu0 }
 0x66f   : > { %1094 = vtanh.f32 %v394_v48  ;;  %v1022_v51 = vpop.f32.mrb[7].mxu0  ;;  %v954_v53 = vmul.f32 -1.442695, %v394_v48  ;;  %v592_v50 = vld [vmem:[%s591_s14] sm:$0xff] }
 0x671   : > { %1096 = vpow2.f32 %v954_v53 }
 0x679   : > { %v1095_v52 = vpop.eup %1094 }
 0x67a   : > { %404 = vrot.lane.b32.xlu0 %v1095_v52, %s1153_s23 }
 0x67b   : > { %v1097_v54 = vpop.eup %1096 }
 0x67c   : > { %v398_v55 = vadd.f32 1.0, %v1097_v54 }
 0x67e   : > { %1098 = vrcp.f32 %v398_v55 }
 0x688   : > { %v1099_v56 = vpop.eup %1098 }
 0x689   : > { %v402_v59 = vmul.f32 %v1099_v56, %v330_v40 }
 0x6ec   : > { %v405_v57 = vpop.permute.xlu0 %404 }
 0x6ed   : > { %v407_v58 = vmul.f32 %v1099_v56, %v405_v57 }
 0x6ef   : > { %409 = vrot.lane.b32.xlu1 %v407_v58, %s1154_s24 }
 0x761   : > { %v410_v60 = vpop.permute.xlu1 %409 }
 0x762   : > { %v412_v61 = vadd.f32 %v410_v60, %v402_v59 }
 0x764   : > { %1100 = vtanh.f32 %v412_v61 }
 0x76e   : > { %v1101_v62 = vpop.eup %1100 }
 0x76f   : > { %415 = vrot.lane.b32.xlu0 %v1101_v62, %s1153_s23 }
 0x7e1   : > { %v416_v63 = vpop.permute.xlu0 %415 }
 0x7e2   : > { %v1278_v3 = vmul.f32 %v1099_v56, %v416_v63 }
 0x7e4   : > { %v429_v4 = vpack.c.bf16 %v1278_v3, %v1278_v3 }
 0x7e6   : > { %431 = vrot.lane.b32.xlu1 %v429_v4, %s1154_s24 }
 0x858   : > { %v432_v5 = vpop.permute.xlu1 %431 }
 0x859   : > { %1028 = vmatmul.mubr.msk.bf16.vlgmr.msra.gmra.mrb[4].mxu1 %vm186_vm1, %v432_v5 }
 0x85a   : > { %1040 = vmatpush3.bf16.msra.mxu1 %v1194_v1  ;;  %1043 = vmatprep.mubr.msk.bf16.mxu1 %vm1151_vm0, %v1150_v0 }
 0x85b   : > { %1041 = vmatprep.subr.bf16.mxu1 %v1150_v0 }
 0x85e   : > { %1042 = vmatpush3.bf16.msra.mxu1 %v1197_v2 }
 0x85f   : > { %1055 = vmatprep.subr.bf16.mxu1 %v1150_v0 }
 0x92c   : > { %v470_v7 = vpop.f32.mrb[4].mxu1 }
 0x92d   : > { %v476_v8 = vadd.f32 %v470_v7, %v428_v6  ;;  %v1029_v9 = vpop.f32.mrb[5].mxu1 }
 0x92e   : > { %v473_v10 = vpop.f32.mrb[6].mxu1 }
 0x92f   : > { %1102 = vtanh.f32 %v476_v8  ;;  %v1030_v11 = vpop.f32.mrb[7].mxu1  ;;  %v957_v13 = vmul.f32 -1.442695, %v476_v8  ;;  %v674_v8 = vld [vmem:[%s673_s19] sm:$0xff] }
 0x931   : > { %1104 = vpow2.f32 %v957_v13 }
 0x939   : > { %v1103_v12 = vpop.eup %1102 }
 0x93a   : > { %486 = vrot.lane.b32.xlu0 %v1103_v12, %s1153_s23 }
 0x93b   : > { %v1105_v14 = vpop.eup %1104 }
 0x93c   : > { %v480_v15 = vadd.f32 1.0, %v1105_v14 }
 0x93e   : > { %1106 = vrcp.f32 %v480_v15 }
 0x948   : > { %v1107_v16 = vpop.eup %1106 }
 0x949   : > { %v484_v19 = vmul.f32 %v1107_v16, %v412_v61 }
 0x9ac   : > { %v487_v17 = vpop.permute.xlu0 %486 }
 0x9ad   : > { %v489_v18 = vmul.f32 %v1107_v16, %v487_v17 }
 0x9af   : > { %491 = vrot.lane.b32.xlu1 %v489_v18, %s1154_s24 }
 0xa21   : > { %v492_v20 = vpop.permute.xlu1 %491 }
 0xa22   : > { %v494_v21 = vadd.f32 %v492_v20, %v484_v19 }
 0xa24   : > { %1108 = vtanh.f32 %v494_v21 }
 0xa2e   : > { %v1109_v23 = vpop.eup %1108 }
 0xa2f   : > { %497 = vrot.lane.b32.xlu0 %v1109_v23, %s1153_s23 }
 0xaa1   : > { %v498_v24 = vpop.permute.xlu0 %497 }
 0xaa2   : > { %v1301_v25 = vmul.f32 %v1107_v16, %v498_v24 }
 0xaa4   : > { %v511_v26 = vpack.c.bf16 %v1301_v25, %v1301_v25 }
 0xaa6   : > { %513 = vrot.lane.b32.xlu1 %v511_v26, %s1154_s24 }
 0xb18   : > { %v514_v27 = vpop.permute.xlu1 %513 }
 0xb19   : > { %1036 = vmatmul.mubr.msk.bf16.vlgmr.msra.gmra.mrb[8].mxu0 %vm186_vm1, %v514_v27 }
 0xb1a   : > { %1048 = vmatpush3.bf16.msra.mxu0 %v1194_v1  ;;  %1051 = vmatprep.mubr.msk.bf16.mxu0 %vm1151_vm0, %v1150_v0 }
 0xb1b   : > { %1049 = vmatprep.subr.bf16.mxu0 %v1150_v0 }
 0xb1e   : > { %1050 = vmatpush3.bf16.msra.mxu0 %v1197_v2 }
 0xbec   : > { %v552_v29 = vpop.f32.mrb[8].mxu0 }
 0xbed   : > { %v558_v30 = vadd.f32 %v552_v29, %v510_v28  ;;  %v1037_v31 = vpop.f32.mrb[9].mxu0 }
 0xbee   : > { %v555_v32 = vpop.f32.mrb[10].mxu0  ;;  %v756_v31 = vld [vmem:[%s755_s30] sm:$0xff] }
 0xbef   : > { %1110 = vtanh.f32 %v558_v30  ;;  %v1038_v33 = vpop.f32.mrb[11].mxu0  ;;  %v960_v35 = vmul.f32 -1.442695, %v558_v30 }
 0xbf1   : > { %1112 = vpow2.f32 %v960_v35 }
 0xbf9   : > { %v1111_v34 = vpop.eup %1110 }
 0xbfa   : > { %568 = vrot.lane.b32.xlu0 %v1111_v34, %s1153_s23 }
 0xbfb   : > { %v1113_v36 = vpop.eup %1112 }
 0xbfc   : > { %v562_v37 = vadd.f32 1.0, %v1113_v36 }
 0xbfe   : > { %1114 = vrcp.f32 %v562_v37 }
 0xc08   : > { %v1115_v38 = vpop.eup %1114 }
 0xc09   : > { %v566_v41 = vmul.f32 %v1115_v38, %v494_v21 }
 0xc6c   : > { %v569_v39 = vpop.permute.xlu0 %568 }
 0xc6d   : > { %v571_v40 = vmul.f32 %v1115_v38, %v569_v39 }
 0xc6f   : > { %573 = vrot.lane.b32.xlu1 %v571_v40, %s1154_s24 }
 0xce1   : > { %v574_v42 = vpop.permute.xlu1 %573 }
 0xce2   : > { %v576_v44 = vadd.f32 %v574_v42, %v566_v41 }
 0xce4   : > { %1116 = vtanh.f32 %v576_v44 }
 0xcee   : > { %v1117_v45 = vpop.eup %1116 }
 0xcef   : > { %579 = vrot.lane.b32.xlu0 %v1117_v45, %s1153_s23 }
 0xd61   : > { %v580_v46 = vpop.permute.xlu0 %579 }
 0xd62   : > { %v1323_v47 = vmul.f32 %v1115_v38, %v580_v46 }
 0xd64   : > { %v593_v48 = vpack.c.bf16 %v1323_v47, %v1323_v47 }
 0xd66   : > { %595 = vrot.lane.b32.xlu1 %v593_v48, %s1154_s24 }
 0xdd8   : > { %v596_v49 = vpop.permute.xlu1 %595 }
 0xdd9   : > { %1044 = vmatmul.mubr.msk.bf16.vlgmr.msra.gmra.mrb[8].mxu1 %vm186_vm1, %v596_v49 }
 0xdda   : > { %1056 = vmatpush3.bf16.msra.mxu1 %v1194_v1  ;;  %1059 = vmatprep.mubr.msk.bf16.mxu1 %vm1151_vm0, %v1150_v0 }
 0xddb   : > { %1057 = vmatprep.subr.bf16.mxu1 %v1150_v0 }
 0xdde   : > { %1058 = vmatpush3.bf16.msra.mxu1 %v1197_v2 }
 0xeac   : > { %v634_v51 = vpop.f32.mrb[8].mxu1 }
 0xead   : > { %v640_v52 = vadd.f32 %v634_v51, %v592_v50  ;;  %v1045_v53 = vpop.f32.mrb[9].mxu1 }
 0xeae   : > { %v637_v1 = vpop.f32.mrb[10].mxu1 }
 0xeaf   : > { %1118 = vtanh.f32 %v640_v52  ;;  %v1046_v54 = vpop.f32.mrb[11].mxu1  ;;  %v963_v0 = vmul.f32 -1.442695, %v640_v52 }
 0xeb1   : > { %1120 = vpow2.f32 %v963_v0 }
 0xeb9   : > { %v1119_v55 = vpop.eup %1118 }
 0xeba   : > { %650 = vrot.lane.b32.xlu0 %v1119_v55, %s1153_s23 }
 0xebb   : > { %v1121_v2 = vpop.eup %1120 }
 0xebc   : > { %v644_v56 = vadd.f32 1.0, %v1121_v2 }
 0xebe   : > { %1122 = vrcp.f32 %v644_v56 }
 0xec8   : > { %v1123_v57 = vpop.eup %1122 }
 0xec9   : > { %v648_v60 = vmul.f32 %v1123_v57, %v576_v44 }
 0xf2c   : > { %v651_v58 = vpop.permute.xlu0 %650 }
 0xf2d   : > { %v653_v59 = vmul.f32 %v1123_v57, %v651_v58 }
 0xf2f   : > { %655 = vrot.lane.b32.xlu1 %v653_v59, %s1154_s24 }
 0xfa1   : > { %v656_v61 = vpop.permute.xlu1 %655 }
 0xfa2   : > { %v658_v62 = vadd.f32 %v656_v61, %v648_v60 }
 0xfa4   : > { %1124 = vtanh.f32 %v658_v62 }
 0xfae   : > { %v1125_v63 = vpop.eup %1124 }
 0xfaf   : > { %661 = vrot.lane.b32.xlu0 %v1125_v63, %s1153_s23 }
0x1021   : > { %v662_v4 = vpop.permute.xlu0 %661 }
0x1022   : > { %v1345_v5 = vmul.f32 %v1123_v57, %v662_v4 }
0x1024   : > { %v675_v6 = vpack.c.bf16 %v1345_v5, %v1345_v5 }
0x1026   : > { %677 = vrot.lane.b32.xlu1 %v675_v6, %s1154_s24 }
0x1098   : > { %v678_v7 = vpop.permute.xlu1 %677 }
0x1099   : > { %1052 = vmatmul.mubr.msk.bf16.vlgmr.msra.gmra.mrb[12].mxu0 %vm186_vm1, %v678_v7 }
0x116c   : > { %v716_v9 = vpop.f32.mrb[12].mxu0 }
0x116d   : > { %v722_v10 = vadd.f32 %v716_v9, %v674_v8  ;;  %v1053_v11 = vpop.f32.mrb[13].mxu0 }
0x116e   : > { %v719_v12 = vpop.f32.mrb[14].mxu0 }
0x116f   : > { %1126 = vtanh.f32 %v722_v10  ;;  %v1054_v13 = vpop.f32.mrb[15].mxu0  ;;  %v966_v15 = vmul.f32 -1.442695, %v722_v10 }
0x1171   : > { %1128 = vpow2.f32 %v966_v15 }
0x1179   : > { %v1127_v14 = vpop.eup %1126 }
0x117a   : > { %732 = vrot.lane.b32.xlu0 %v1127_v14, %s1153_s23 }
0x117b   : > { %v1129_v16 = vpop.eup %1128 }
0x117c   : > { %v726_v17 = vadd.f32 1.0, %v1129_v16 }
0x117e   : > { %1130 = vrcp.f32 %v726_v17 }
0x1188   : > { %v1131_v18 = vpop.eup %1130 }
0x1189   : > { %v730_v21 = vmul.f32 %v1131_v18, %v658_v62 }
0x11ec   : > { %v733_v19 = vpop.permute.xlu0 %732 }
0x11ed   : > { %v735_v20 = vmul.f32 %v1131_v18, %v733_v19 }
0x11ef   : > { %737 = vrot.lane.b32.xlu1 %v735_v20, %s1154_s24 }
0x1261   : > { %v738_v23 = vpop.permute.xlu1 %737 }
0x1262   : > { %v740_v24 = vadd.f32 %v738_v23, %v730_v21 }
0x1264   : > { %1132 = vtanh.f32 %v740_v24 }
0x126e   : > { %v1133_v26 = vpop.eup %1132 }
0x126f   : > { %743 = vrot.lane.b32.xlu0 %v1133_v26, %s1153_s23 }
0x12e1   : > { %v744_v27 = vpop.permute.xlu0 %743 }
0x12e2   : > { %v746_v28 = vmul.f32 %v1131_v18, %v744_v27 }
0x12e4   : > { %v757_v29 = vpack.c.bf16 %v746_v28, %v746_v28 }
0x12e6   : > { %759 = vrot.lane.b32.xlu1 %v757_v29, %s1154_s24 }
0x1358   : > { %v760_v30 = vpop.permute.xlu1 %759 }
0x1359   : > { %1060 = vmatmul.mubr.msk.bf16.vlgmr.msra.gmra.mrb[12].mxu1 %vm186_vm1, %v760_v30 }
0x142c   : > { %v798_v32 = vpop.f32.mrb[12].mxu1 }
0x142d   : > { %v804_v33 = vadd.f32 %v798_v32, %v756_v31  ;;  %v1061_v34 = vpop.f32.mrb[13].mxu1 }
0x142e   : > { %v801_v35 = vpop.f32.mrb[14].mxu1 }
0x142f   : > { %1134 = vtanh.f32 %v804_v33  ;;  %v1062_v36 = vpop.f32.mrb[15].mxu1  ;;  %v969_v38 = vmul.f32 -1.442695, %v804_v33 }
0x1431   : > { %1136 = vpow2.f32 %v969_v38 }
0x1439   : > { %v1135_v37 = vpop.eup %1134 }
0x143a   : > { %814 = vrot.lane.b32.xlu0 %v1135_v37, %s1153_s23 }
0x143b   : > { %v1137_v39 = vpop.eup %1136 }
0x143c   : > { %v808_v40 = vadd.f32 1.0, %v1137_v39 }
0x143e   : > { %1138 = vrcp.f32 %v808_v40 }
0x1448   : > { %v1139_v41 = vpop.eup %1138 }
0x1449   : > { %v812_v45 = vmul.f32 %v1139_v41, %v740_v24 }
0x14ac   : > { %v815_v42 = vpop.permute.xlu0 %814 }
0x14ad   : > { %v817_v44 = vmul.f32 %v1139_v41, %v815_v42 }
0x14af   : > { %819 = vrot.lane.b32.xlu1 %v817_v44, %s1154_s24 }
0x14b3   : > { %256 = vrot.lane.b32.xlu1 %v1232_v22, %s1154_s24 }
0x14b7   : > { %420 = vrot.lane.b32.xlu1 %v1278_v3, %s1154_s24 }
0x14bb   : > { %584 = vrot.lane.b32.xlu1 %v1323_v47, %s1154_s24 }
0x14bf   : > { %748 = vrot.lane.b32.xlu1 %v746_v28, %s1154_s24 }
0x1521   : > { %v820_v22 = vpop.permute.xlu1 %819 }
0x1522   : > { %v822_v46 = vadd.f32 %v820_v22, %v812_v45 }
0x1524   : > { %1140 = vtanh.f32 %v822_v46 }
0x1525   : > { %v257_v3 = vpop.permute.xlu1 %256 }
0x1526   : > { %260 = vst.msk [vmem:[%s259_s8] sm:$0xff] %vm186_vm1, %v257_v3 }
0x1529   : > { %v421_v49 = vpop.permute.xlu1 %420 }
0x152e   : > { %v1141_v47 = vpop.eup %1140 }
0x152f   : > { %825 = vrot.lane.b32.xlu0 %v1141_v47, %s1153_s23  ;;  %s669_s23 = scalar_lea.vmem %s1386_s5, %s961_s13 }
0x1533   : > { %338 = vrot.lane.b32.xlu0 %v1255_v43, %s1154_s24 }
0x1537   : > { %502 = vrot.lane.b32.xlu0 %v1301_v25, %s1154_s24  ;;  %v585_v25 = vpop.permute.xlu1 %584 }
0x153b   : > { %666 = vrot.lane.b32.xlu0 %v1345_v5, %s1154_s24  ;;  %v749_v53 = vpop.permute.xlu1 %748 }
0x15a1   : > { %v826_v48 = vpop.permute.xlu0 %825 }
0x15a2   : > { %v828_v50 = vmul.f32 %v1139_v41, %v826_v48 }
0x15a4   : > { %830 = vrot.lane.b32.xlu0 %v828_v50, %s1154_s24  ;;  %s751_s24 = scalar_lea.vmem %s1386_s5, %s964_s18 }
0x15a5   : > { %v339_v43 = vpop.permute.xlu0 %338 }
0x15a6   : > { %342 = vst.msk [vmem:[%s341_s11] sm:$0xff] %vm186_vm1, %v339_v43 }
0x15a7   : > { %424 = vst.msk [vmem:[%s423_s16] sm:$0xff] %vm186_vm1, %v421_v49 }
0x15a9   : > { %v503_v51 = vpop.permute.xlu0 %502 }
0x15aa   : > { %506 = vst.msk [vmem:[%s505_s17] sm:$0xff] %vm186_vm1, %v503_v51 }
0x15ab   : > { %588 = vst.msk [vmem:[%s587_s21] sm:$0xff] %vm186_vm1, %v585_v25 }
0x15ad   : > { %v667_v52 = vpop.permute.xlu0 %666 }
0x15ae   : > { %670 = vst.msk [vmem:[%s669_s23] sm:$0xff] %vm186_vm1, %v667_v52 }
0x15af   : > { %752 = vst.msk [vmem:[%s751_s24] sm:$0xff] %vm186_vm1, %v749_v53 }
0x1616   : > { %v831_v1 = vpop.permute.xlu0 %830 }
0x1617   : > { %834 = vst.msk [vmem:[%s833_s25] sm:$0xff] %vm186_vm1, %v831_v1 }
0x1618 PF: > { %s12_s9 = sadd.s32 1, %s1148_s9  }
0x1619   : > { %p9_p5 = scmp.ge.s32.totalorder %s12_s9, 4  }
0x161b   :  { %11 = sbr.rel (!%p9_p5) target bundleno = 1 (0x1), region = 77 }

</bundles_post_ra>
